<compile_context>
chip_gen: v7x
topology: tpu7x:2x2x1
jax: 0.10.0
libtpu: 0.0.40
codegen_flags: <defaults>
</compile_context>

<pallas_src>
import functools

import numpy as np
import jax
import jax.numpy as jnp
from jax import lax
from jax.experimental import pallas as pl
from jax.experimental.pallas import tpu as pltpu

C_OUT, KH, KW = 7, 6, 6
H_IN = W_IN = 32
H_CONV = (H_IN - KH) // 2 + 1          # 14 conv output rows/cols
H_POOL = H_CONV // 2                   # 7 pooled rows/cols
P = H_POOL * H_POOL                    # 49 pooled spatial positions
FEAT = C_OUT * P                       # 343 (matches the module's probe)
HID = 64
OUT = 32

LANE_BLK = 128                         # padded per-kh lane block (dw*49 + wo*7 + c)
M = 2 * H_POOL * C_OUT                 # 98 valid lanes per kh block
ROW_BLK = 8                            # padded per-dh sublane block (rows dh*8 + ho)
ROWS_PER_B = 2 * ROW_BLK               # 16 packed output rows per image


# ---------------------------------------------------------------- kernel ----

def _encoder_kernel(xf_ref, cw_ref, rsb_ref, bc_ref, w1p_ref, b1_ref, w2_ref,
                    b2_ref, slopes_ref, out_ref):
    B = out_ref.shape[0]
    a1 = slopes_ref[0]                 # PReLU slope of the conv stage (SMEM scalar)
    a2 = slopes_ref[1]                 # PReLU slope of the head (SMEM scalar)

    # ---- stage 1: contract conv width taps + expand channels (one matmul) ---
    #   t[b*32 + r, kh*128 + dw*49 + wo*7 + c]
    #       = sum_kw x[b, r, 4*wo + 2*dw + kw] * w[c, kh, kw]
    t = jnp.dot(xf_ref[...], cw_ref[...],
                preferred_element_type=jnp.float32)            # (B*32, 768)

    # ---- stage 2: select conv rows / reduce over kernel rows kh -------------
    #   y[b*16 + dh*8 + ho, n] = bias[n] + sum_kh t[b*32 + 4*ho+2*dh+kh, kh*128+n]
    # rsb[kh] is a 0/1 block-diagonal (over batch) row-selection matrix.
    y = jnp.broadcast_to(bc_ref[...], (B * ROWS_PER_B, LANE_BLK))
    for kh in range(KH):
        y = y + jnp.dot(rsb_ref[kh],
                        t[:, kh * LANE_BLK:(kh + 1) * LANE_BLK],
                        preferred_element_type=jnp.float32)    # (B*16, 128)

    # PReLU once, over all four pool candidates packed in y
    y = jnp.where(y > 0, y, a1 * y)

    # 2x2 max-pool: dh lives in sublane blocks (offset 8), dw in lane halves.
    y3 = y.reshape(B, ROWS_PER_B, LANE_BLK)                    # tile-preserving
    z = jnp.maximum(y3[:, 0:H_POOL, :],
                    y3[:, ROW_BLK:ROW_BLK + H_POOL, :])        # (B, 7, 128)
    pooled = jnp.maximum(z[:, :, 0:P], z[:, :, P:2 * P])       # (B, 7, 49)

    # ---- head: Linear(343,64) -> PReLU -> Linear(64,32), all in VMEM --------
    # w1 rows were pre-permuted to (ho, wo, c) order and split per pooled row,
    # so the CHW flatten is 7 accumulated matmuls (no transpose in-kernel).
    h = jnp.broadcast_to(b1_ref[...], (B, HID))
    for ho in range(H_POOL):
        h = h + jnp.dot(pooled[:, ho, :], w1p_ref[ho],
                        preferred_element_type=jnp.float32)
    h = jnp.where(h > 0, h, a2 * h)

    out_ref[...] = (jnp.dot(h, w2_ref[...], preferred_element_type=jnp.float32)
                    + b2_ref[...])


# ------------------------------------------------------- parameter folding --

def prepare_params(params):
    """One-time folding of the PyTorch-layout weights into kernel layouts."""
    w = np.asarray(params["w_conv"], np.float32).reshape(C_OUT, KH, KW)

    # Folded conv weights: cw[col, kh*128 + dw*49 + wo*7 + c] = w[c, kh, kw]
    # with col = 4*wo + 2*dw + kw (kw = width tap, dw = pool offset, wo = pooled col).
    cw = np.zeros((W_IN, KH * LANE_BLK), np.float32)
    for kh in range(KH):
        for dw in range(2):
            for wo in range(H_POOL):
                base = kh * LANE_BLK + dw * P + wo * C_OUT
                for kw in range(KW):
                    col = 4 * wo + 2 * dw + kw
                    cw[col, base: base + C_OUT] = w[:, kh, kw]

    # Conv bias tiled over (dw, wo) -> lane index dw*49 + wo*7 + c (zero-padded to 128)
    bc = np.zeros((1, LANE_BLK), np.float32)
    bconv = np.asarray(params["b_conv"], np.float32)
    for dw in range(2):
        for wo in range(H_POOL):
            base = dw * P + wo * C_OUT
            bc[0, base: base + C_OUT] = bconv

    # First FC: rows re-ordered from torch's (c, ho, wo) flatten to (ho, wo, c)
    # and split per pooled row ho -> (7, 49, 64)
    w1 = np.asarray(params["w1"], np.float32).reshape(C_OUT, H_POOL, H_POOL, HID)
    w1p = np.transpose(w1, (1, 2, 0, 3)).reshape(H_POOL, P, HID)

    return {
        "cw": jnp.asarray(cw),
        "bc": jnp.asarray(bc),
        "w1p": jnp.asarray(w1p),
        "b1": jnp.asarray(np.asarray(params["b1"], np.float32).reshape(1, HID)),
        "w2": jnp.asarray(np.asarray(params["w2"], np.float32)),
        "b2": jnp.asarray(np.asarray(params["b2"], np.float32).reshape(1, OUT)),
        "slopes": jnp.asarray(np.array([float(np.asarray(params["a1"])),
                                        float(np.asarray(params["a2"]))],
                                       np.float32)),
    }


@functools.lru_cache(maxsize=None)
def _row_select(batch):
    """Block-diagonal (over batch) 0/1 row-selection matrices, one per kh.

    rsb[kh, b*16 + dh*8 + ho, b*32 + 4*ho + 2*dh + kh] = 1
    Purely structural (no weight dependence); built once per batch size.
    """
    rsb = np.zeros((KH, batch * ROWS_PER_B, batch * H_IN), np.float32)
    for kh in range(KH):
        for b in range(batch):
            for dh in range(2):
                for ho in range(H_POOL):
                    rsb[kh,
                        b * ROWS_PER_B + dh * ROW_BLK + ho,
                        b * H_IN + 4 * ho + 2 * dh + kh] = 1.0
    return jnp.asarray(rsb)


# ----------------------------------------------------------------- forward --

def encoder_forward(x, prep):
    B = x.shape[0]
    xf = x.reshape(B * H_IN, W_IN)     # fold batch into sublanes (free reshape)
    rsb = _row_select(B)

    vm = pl.BlockSpec(memory_space=pltpu.MemorySpace.VMEM)
    sm = pl.BlockSpec(memory_space=pltpu.MemorySpace.SMEM)
    return pl.pallas_call(
        _encoder_kernel,
        out_shape=jax.ShapeDtypeStruct((B, OUT), jnp.float32),
        in_specs=[vm, vm, vm, vm, vm, vm, vm, vm, sm],
        out_specs=vm,
    )(xf, prep["cw"], rsb, prep["bc"], prep["w1p"], prep["b1"],
      prep["w2"], prep["b2"], prep["slopes"])


# ----------------------------------------------------------- pure-JAX ref ---

def encoder_reference(x, params):
    y = lax.conv_general_dilated(
        x, params["w_conv"], window_strides=(2, 2), padding="VALID",
        dimension_numbers=("NCHW", "OIHW", "NCHW"))
    y = y + params["b_conv"].reshape(1, C_OUT, 1, 1)
    y = jnp.where(y > 0, y, params["a1"] * y)
    y = lax.reduce_window(y, -jnp.inf, lax.max, (1, 1, 2, 2), (1, 1, 2, 2), "VALID")
    f = y.reshape(x.shape[0], -1)                         # CHW flatten, like x.view(B,-1)
    h = jnp.dot(f, params["w1"]) + params["b1"]
    h = jnp.where(h > 0, h, params["a2"] * h)
    return jnp.dot(h, params["w2"]) + params["b2"]


# ------------------------------------------------------------------- main ---

if __name__ == "__main__":
    key = jax.random.PRNGKey(0)
    ks = jax.random.split(key, 8)
    params = {
        "w_conv": 0.1 * jax.random.normal(ks[0], (C_OUT, 1, KH, KW), jnp.float32),
        "b_conv": 0.1 * jax.random.normal(ks[1], (C_OUT,), jnp.float32),
        "a1": jnp.array(0.25, jnp.float32),               # PReLU default init
        "w1": 0.05 * jax.random.normal(ks[2], (FEAT, HID), jnp.float32),
        "b1": 0.05 * jax.random.normal(ks[3], (HID,), jnp.float32),
        "a2": jnp.array(0.25, jnp.float32),
        "w2": 0.05 * jax.random.normal(ks[4], (HID, OUT), jnp.float32),
        "b2": 0.05 * jax.random.normal(ks[5], (OUT,), jnp.float32),
    }
    x = jax.random.uniform(ks[6], (2, 1, H_IN, W_IN), jnp.float32)

    prep = prepare_params(params)          # one-time weight folding (not per-forward)
    out = jax.block_until_ready(encoder_forward(x, prep))
    ref = jax.block_until_ready(encoder_reference(x, params))

    assert out.shape == (2, OUT)
    np.testing.assert_allclose(np.asarray(out), np.asarray(ref), rtol=2e-2, atol=2e-2)
    print("KERNEL_OK")
</pallas_src>

<mosaic_0001>
module attributes {stable_mosaic.version = 11 : i64} {
  func.func @_encoder_kernel(%arg0: memref<64x32xf32, #tpu.memory_space<vmem>>, %arg1: memref<32x768xf32, #tpu.memory_space<vmem>>, %arg2: memref<6x32x64xf32, #tpu.memory_space<vmem>>, %arg3: memref<1x128xf32, #tpu.memory_space<vmem>>, %arg4: memref<7x49x64xf32, #tpu.memory_space<vmem>>, %arg5: memref<1x64xf32, #tpu.memory_space<vmem>>, %arg6: memref<64x32xf32, #tpu.memory_space<vmem>>, %arg7: memref<1x32xf32, #tpu.memory_space<vmem>>, %arg8: memref<2xf32, #tpu.memory_space<smem>>, %arg9: memref<2x32xf32, #tpu.memory_space<vmem>>) attributes {dimension_semantics = [], scalar_prefetch = 0 : i64, scratch_operands = 0 : i64, tpu.core_type = #tpu.core_type<tc>} {
    %c0 = arith.constant 0 : index
    %0 = memref.load %arg8[%c0] : memref<2xf32, #tpu.memory_space<smem>>
    %c1 = arith.constant 1 : index
    %1 = memref.load %arg8[%c1] : memref<2xf32, #tpu.memory_space<smem>>
    %c0_0 = arith.constant 0 : index
    %c0_1 = arith.constant 0 : index
    %2 = vector.load %arg0[%c0_0, %c0_1] : memref<64x32xf32, #tpu.memory_space<vmem>>, vector<64x32xf32>
    %c0_2 = arith.constant 0 : index
    %c0_3 = arith.constant 0 : index
    %3 = vector.load %arg1[%c0_2, %c0_3] : memref<32x768xf32, #tpu.memory_space<vmem>>, vector<32x768xf32>
    %cst = arith.constant dense<0.000000e+00> : vector<64x768xf32>
    %4 = tpu.matmul %2, %3, %cst {dimension_numbers = #tpu.dot_dimension_numbers<[1], [0], [0], [1], [0, 0, 1, 1], [], []>} : vector<64x32xf32>, vector<32x768xf32>, vector<64x768xf32> -> vector<64x768xf32>
    %c0_4 = arith.constant 0 : index
    %c0_5 = arith.constant 0 : index
    %5 = vector.load %arg3[%c0_4, %c0_5] : memref<1x128xf32, #tpu.memory_space<vmem>>, vector<1x128xf32>
    %6 = vector.shape_cast %5 : vector<1x128xf32> to vector<1x128xf32>
    %7 = vector.broadcast %6 : vector<1x128xf32> to vector<32x128xf32>
    %c0_6 = arith.constant 0 : index
    %c0_7 = arith.constant 0 : index
    %c0_8 = arith.constant 0 : index
    %8 = vector.load %arg2[%c0_6, %c0_7, %c0_8] : memref<6x32x64xf32, #tpu.memory_space<vmem>>, vector<1x32x64xf32>
    %9 = vector.shape_cast %8 : vector<1x32x64xf32> to vector<32x64xf32>
    %10 = vector.extract_strided_slice %4 {offsets = [0, 0], sizes = [64, 128], strides = [1, 1]} : vector<64x768xf32> to vector<64x128xf32>
    %cst_9 = arith.constant dense<0.000000e+00> : vector<32x128xf32>
    %11 = tpu.matmul %9, %10, %cst_9 {dimension_numbers = #tpu.dot_dimension_numbers<[1], [0], [0], [1], [0, 0, 1, 1], [], []>} : vector<32x64xf32>, vector<64x128xf32>, vector<32x128xf32> -> vector<32x128xf32>
    %12 = arith.addf %7, %11 : vector<32x128xf32>
    %c1_10 = arith.constant 1 : index
    %c0_11 = arith.constant 0 : index
    %c0_12 = arith.constant 0 : index
    %13 = vector.load %arg2[%c1_10, %c0_11, %c0_12] : memref<6x32x64xf32, #tpu.memory_space<vmem>>, vector<1x32x64xf32>
    %14 = vector.shape_cast %13 : vector<1x32x64xf32> to vector<32x64xf32>
    %15 = vector.extract_strided_slice %4 {offsets = [0, 128], sizes = [64, 128], strides = [1, 1]} : vector<64x768xf32> to vector<64x128xf32>
    %cst_13 = arith.constant dense<0.000000e+00> : vector<32x128xf32>
    %16 = tpu.matmul %14, %15, %cst_13 {dimension_numbers = #tpu.dot_dimension_numbers<[1], [0], [0], [1], [0, 0, 1, 1], [], []>} : vector<32x64xf32>, vector<64x128xf32>, vector<32x128xf32> -> vector<32x128xf32>
    %17 = arith.addf %12, %16 : vector<32x128xf32>
    %c2 = arith.constant 2 : index
    %c0_14 = arith.constant 0 : index
    %c0_15 = arith.constant 0 : index
    %18 = vector.load %arg2[%c2, %c0_14, %c0_15] : memref<6x32x64xf32, #tpu.memory_space<vmem>>, vector<1x32x64xf32>
    %19 = vector.shape_cast %18 : vector<1x32x64xf32> to vector<32x64xf32>
    %20 = vector.extract_strided_slice %4 {offsets = [0, 256], sizes = [64, 128], strides = [1, 1]} : vector<64x768xf32> to vector<64x128xf32>
    %cst_16 = arith.constant dense<0.000000e+00> : vector<32x128xf32>
    %21 = tpu.matmul %19, %20, %cst_16 {dimension_numbers = #tpu.dot_dimension_numbers<[1], [0], [0], [1], [0, 0, 1, 1], [], []>} : vector<32x64xf32>, vector<64x128xf32>, vector<32x128xf32> -> vector<32x128xf32>
    %22 = arith.addf %17, %21 : vector<32x128xf32>
    %c3 = arith.constant 3 : index
    %c0_17 = arith.constant 0 : index
    %c0_18 = arith.constant 0 : index
    %23 = vector.load %arg2[%c3, %c0_17, %c0_18] : memref<6x32x64xf32, #tpu.memory_space<vmem>>, vector<1x32x64xf32>
    %24 = vector.shape_cast %23 : vector<1x32x64xf32> to vector<32x64xf32>
    %25 = vector.extract_strided_slice %4 {offsets = [0, 384], sizes = [64, 128], strides = [1, 1]} : vector<64x768xf32> to vector<64x128xf32>
    %cst_19 = arith.constant dense<0.000000e+00> : vector<32x128xf32>
    %26 = tpu.matmul %24, %25, %cst_19 {dimension_numbers = #tpu.dot_dimension_numbers<[1], [0], [0], [1], [0, 0, 1, 1], [], []>} : vector<32x64xf32>, vector<64x128xf32>, vector<32x128xf32> -> vector<32x128xf32>
    %27 = arith.addf %22, %26 : vector<32x128xf32>
    %c4 = arith.constant 4 : index
    %c0_20 = arith.constant 0 : index
    %c0_21 = arith.constant 0 : index
    %28 = vector.load %arg2[%c4, %c0_20, %c0_21] : memref<6x32x64xf32, #tpu.memory_space<vmem>>, vector<1x32x64xf32>
    %29 = vector.shape_cast %28 : vector<1x32x64xf32> to vector<32x64xf32>
    %30 = vector.extract_strided_slice %4 {offsets = [0, 512], sizes = [64, 128], strides = [1, 1]} : vector<64x768xf32> to vector<64x128xf32>
    %cst_22 = arith.constant dense<0.000000e+00> : vector<32x128xf32>
    %31 = tpu.matmul %29, %30, %cst_22 {dimension_numbers = #tpu.dot_dimension_numbers<[1], [0], [0], [1], [0, 0, 1, 1], [], []>} : vector<32x64xf32>, vector<64x128xf32>, vector<32x128xf32> -> vector<32x128xf32>
    %32 = arith.addf %27, %31 : vector<32x128xf32>
    %c5 = arith.constant 5 : index
    %c0_23 = arith.constant 0 : index
    %c0_24 = arith.constant 0 : index
    %33 = vector.load %arg2[%c5, %c0_23, %c0_24] : memref<6x32x64xf32, #tpu.memory_space<vmem>>, vector<1x32x64xf32>
    %34 = vector.shape_cast %33 : vector<1x32x64xf32> to vector<32x64xf32>
    %35 = vector.extract_strided_slice %4 {offsets = [0, 640], sizes = [64, 128], strides = [1, 1]} : vector<64x768xf32> to vector<64x128xf32>
    %cst_25 = arith.constant dense<0.000000e+00> : vector<32x128xf32>
    %36 = tpu.matmul %34, %35, %cst_25 {dimension_numbers = #tpu.dot_dimension_numbers<[1], [0], [0], [1], [0, 0, 1, 1], [], []>} : vector<32x64xf32>, vector<64x128xf32>, vector<32x128xf32> -> vector<32x128xf32>
    %37 = arith.addf %32, %36 : vector<32x128xf32>
    %cst_26 = arith.constant 0.000000e+00 : f32
    %38 = vector.broadcast %cst_26 : f32 to vector<32x128xf32>
    %39 = arith.cmpf ogt, %37, %38 : vector<32x128xf32>
    %40 = vector.broadcast %0 : f32 to vector<32x128xf32>
    %41 = arith.mulf %40, %37 : vector<32x128xf32>
    %42 = arith.select %39, %37, %41 : vector<32x128xi1>, vector<32x128xf32>
    %43 = vector.shape_cast %42 : vector<32x128xf32> to vector<2x16x128xf32>
    %44 = vector.extract_strided_slice %43 {offsets = [0, 0, 0], sizes = [2, 7, 128], strides = [1, 1, 1]} : vector<2x16x128xf32> to vector<2x7x128xf32>
    %45 = vector.extract_strided_slice %43 {offsets = [0, 8, 0], sizes = [2, 7, 128], strides = [1, 1, 1]} : vector<2x16x128xf32> to vector<2x7x128xf32>
    %46 = arith.maximumf %44, %45 : vector<2x7x128xf32>
    %47 = vector.extract_strided_slice %46 {offsets = [0, 0, 0], sizes = [2, 7, 49], strides = [1, 1, 1]} : vector<2x7x128xf32> to vector<2x7x49xf32>
    %48 = vector.extract_strided_slice %46 {offsets = [0, 0, 49], sizes = [2, 7, 49], strides = [1, 1, 1]} : vector<2x7x128xf32> to vector<2x7x49xf32>
    %49 = arith.maximumf %47, %48 : vector<2x7x49xf32>
    %c0_27 = arith.constant 0 : index
    %c0_28 = arith.constant 0 : index
    %50 = vector.load %arg5[%c0_27, %c0_28] : memref<1x64xf32, #tpu.memory_space<vmem>>, vector<1x64xf32>
    %51 = vector.shape_cast %50 : vector<1x64xf32> to vector<1x64xf32>
    %52 = vector.broadcast %51 : vector<1x64xf32> to vector<2x64xf32>
    %53 = vector.extract_strided_slice %49 {offsets = [0, 0, 0], sizes = [2, 1, 49], strides = [1, 1, 1]} : vector<2x7x49xf32> to vector<2x1x49xf32>
    %54 = vector.shape_cast %53 : vector<2x1x49xf32> to vector<2x49xf32>
    %c0_29 = arith.constant 0 : index
    %c0_30 = arith.constant 0 : index
    %c0_31 = arith.constant 0 : index
    %55 = vector.load %arg4[%c0_29, %c0_30, %c0_31] : memref<7x49x64xf32, #tpu.memory_space<vmem>>, vector<1x49x64xf32>
    %56 = vector.shape_cast %55 : vector<1x49x64xf32> to vector<49x64xf32>
    %cst_32 = arith.constant dense<0.000000e+00> : vector<2x64xf32>
    %57 = tpu.matmul %54, %56, %cst_32 {dimension_numbers = #tpu.dot_dimension_numbers<[1], [0], [0], [1], [0, 0, 1, 1], [], []>} : vector<2x49xf32>, vector<49x64xf32>, vector<2x64xf32> -> vector<2x64xf32>
    %58 = arith.addf %52, %57 : vector<2x64xf32>
    %59 = vector.extract_strided_slice %49 {offsets = [0, 1, 0], sizes = [2, 1, 49], strides = [1, 1, 1]} : vector<2x7x49xf32> to vector<2x1x49xf32>
    %60 = vector.shape_cast %59 : vector<2x1x49xf32> to vector<2x49xf32>
    %c1_33 = arith.constant 1 : index
    %c0_34 = arith.constant 0 : index
    %c0_35 = arith.constant 0 : index
    %61 = vector.load %arg4[%c1_33, %c0_34, %c0_35] : memref<7x49x64xf32, #tpu.memory_space<vmem>>, vector<1x49x64xf32>
    %62 = vector.shape_cast %61 : vector<1x49x64xf32> to vector<49x64xf32>
    %cst_36 = arith.constant dense<0.000000e+00> : vector<2x64xf32>
    %63 = tpu.matmul %60, %62, %cst_36 {dimension_numbers = #tpu.dot_dimension_numbers<[1], [0], [0], [1], [0, 0, 1, 1], [], []>} : vector<2x49xf32>, vector<49x64xf32>, vector<2x64xf32> -> vector<2x64xf32>
    %64 = arith.addf %58, %63 : vector<2x64xf32>
    %65 = vector.extract_strided_slice %49 {offsets = [0, 2, 0], sizes = [2, 1, 49], strides = [1, 1, 1]} : vector<2x7x49xf32> to vector<2x1x49xf32>
    %66 = vector.shape_cast %65 : vector<2x1x49xf32> to vector<2x49xf32>
    %c2_37 = arith.constant 2 : index
    %c0_38 = arith.constant 0 : index
    %c0_39 = arith.constant 0 : index
    %67 = vector.load %arg4[%c2_37, %c0_38, %c0_39] : memref<7x49x64xf32, #tpu.memory_space<vmem>>, vector<1x49x64xf32>
    %68 = vector.shape_cast %67 : vector<1x49x64xf32> to vector<49x64xf32>
    %cst_40 = arith.constant dense<0.000000e+00> : vector<2x64xf32>
    %69 = tpu.matmul %66, %68, %cst_40 {dimension_numbers = #tpu.dot_dimension_numbers<[1], [0], [0], [1], [0, 0, 1, 1], [], []>} : vector<2x49xf32>, vector<49x64xf32>, vector<2x64xf32> -> vector<2x64xf32>
    %70 = arith.addf %64, %69 : vector<2x64xf32>
    %71 = vector.extract_strided_slice %49 {offsets = [0, 3, 0], sizes = [2, 1, 49], strides = [1, 1, 1]} : vector<2x7x49xf32> to vector<2x1x49xf32>
    %72 = vector.shape_cast %71 : vector<2x1x49xf32> to vector<2x49xf32>
    %c3_41 = arith.constant 3 : index
    %c0_42 = arith.constant 0 : index
    %c0_43 = arith.constant 0 : index
    %73 = vector.load %arg4[%c3_41, %c0_42, %c0_43] : memref<7x49x64xf32, #tpu.memory_space<vmem>>, vector<1x49x64xf32>
    %74 = vector.shape_cast %73 : vector<1x49x64xf32> to vector<49x64xf32>
    %cst_44 = arith.constant dense<0.000000e+00> : vector<2x64xf32>
    %75 = tpu.matmul %72, %74, %cst_44 {dimension_numbers = #tpu.dot_dimension_numbers<[1], [0], [0], [1], [0, 0, 1, 1], [], []>} : vector<2x49xf32>, vector<49x64xf32>, vector<2x64xf32> -> vector<2x64xf32>
    %76 = arith.addf %70, %75 : vector<2x64xf32>
    %77 = vector.extract_strided_slice %49 {offsets = [0, 4, 0], sizes = [2, 1, 49], strides = [1, 1, 1]} : vector<2x7x49xf32> to vector<2x1x49xf32>
    %78 = vector.shape_cast %77 : vector<2x1x49xf32> to vector<2x49xf32>
    %c4_45 = arith.constant 4 : index
    %c0_46 = arith.constant 0 : index
    %c0_47 = arith.constant 0 : index
    %79 = vector.load %arg4[%c4_45, %c0_46, %c0_47] : memref<7x49x64xf32, #tpu.memory_space<vmem>>, vector<1x49x64xf32>
    %80 = vector.shape_cast %79 : vector<1x49x64xf32> to vector<49x64xf32>
    %cst_48 = arith.constant dense<0.000000e+00> : vector<2x64xf32>
    %81 = tpu.matmul %78, %80, %cst_48 {dimension_numbers = #tpu.dot_dimension_numbers<[1], [0], [0], [1], [0, 0, 1, 1], [], []>} : vector<2x49xf32>, vector<49x64xf32>, vector<2x64xf32> -> vector<2x64xf32>
    %82 = arith.addf %76, %81 : vector<2x64xf32>
    %83 = vector.extract_strided_slice %49 {offsets = [0, 5, 0], sizes = [2, 1, 49], strides = [1, 1, 1]} : vector<2x7x49xf32> to vector<2x1x49xf32>
    %84 = vector.shape_cast %83 : vector<2x1x49xf32> to vector<2x49xf32>
    %c5_49 = arith.constant 5 : index
    %c0_50 = arith.constant 0 : index
    %c0_51 = arith.constant 0 : index
    %85 = vector.load %arg4[%c5_49, %c0_50, %c0_51] : memref<7x49x64xf32, #tpu.memory_space<vmem>>, vector<1x49x64xf32>
    %86 = vector.shape_cast %85 : vector<1x49x64xf32> to vector<49x64xf32>
    %cst_52 = arith.constant dense<0.000000e+00> : vector<2x64xf32>
    %87 = tpu.matmul %84, %86, %cst_52 {dimension_numbers = #tpu.dot_dimension_numbers<[1], [0], [0], [1], [0, 0, 1, 1], [], []>} : vector<2x49xf32>, vector<49x64xf32>, vector<2x64xf32> -> vector<2x64xf32>
    %88 = arith.addf %82, %87 : vector<2x64xf32>
    %89 = vector.extract_strided_slice %49 {offsets = [0, 6, 0], sizes = [2, 1, 49], strides = [1, 1, 1]} : vector<2x7x49xf32> to vector<2x1x49xf32>
    %90 = vector.shape_cast %89 : vector<2x1x49xf32> to vector<2x49xf32>
    %c6 = arith.constant 6 : index
    %c0_53 = arith.constant 0 : index
    %c0_54 = arith.constant 0 : index
    %91 = vector.load %arg4[%c6, %c0_53, %c0_54] : memref<7x49x64xf32, #tpu.memory_space<vmem>>, vector<1x49x64xf32>
    %92 = vector.shape_cast %91 : vector<1x49x64xf32> to vector<49x64xf32>
    %cst_55 = arith.constant dense<0.000000e+00> : vector<2x64xf32>
    %93 = tpu.matmul %90, %92, %cst_55 {dimension_numbers = #tpu.dot_dimension_numbers<[1], [0], [0], [1], [0, 0, 1, 1], [], []>} : vector<2x49xf32>, vector<49x64xf32>, vector<2x64xf32> -> vector<2x64xf32>
    %94 = arith.addf %88, %93 : vector<2x64xf32>
    %cst_56 = arith.constant 0.000000e+00 : f32
    %95 = vector.broadcast %cst_56 : f32 to vector<2x64xf32>
    %96 = arith.cmpf ogt, %94, %95 : vector<2x64xf32>
    %97 = vector.broadcast %1 : f32 to vector<2x64xf32>
    %98 = arith.mulf %97, %94 : vector<2x64xf32>
    %99 = arith.select %96, %94, %98 : vector<2x64xi1>, vector<2x64xf32>
    %c0_57 = arith.constant 0 : index
    %c0_58 = arith.constant 0 : index
    %100 = vector.load %arg6[%c0_57, %c0_58] : memref<64x32xf32, #tpu.memory_space<vmem>>, vector<64x32xf32>
    %cst_59 = arith.constant dense<0.000000e+00> : vector<2x32xf32>
    %101 = tpu.matmul %99, %100, %cst_59 {dimension_numbers = #tpu.dot_dimension_numbers<[1], [0], [0], [1], [0, 0, 1, 1], [], []>} : vector<2x64xf32>, vector<64x32xf32>, vector<2x32xf32> -> vector<2x32xf32>
    %c0_60 = arith.constant 0 : index
    %c0_61 = arith.constant 0 : index
    %102 = vector.load %arg7[%c0_60, %c0_61] : memref<1x32xf32, #tpu.memory_space<vmem>>, vector<1x32xf32>
    %103 = vector.broadcast %102 : vector<1x32xf32> to vector<2x32xf32>
    %104 = arith.addf %101, %103 : vector<2x32xf32>
    %c0_62 = arith.constant 0 : index
    %c0_63 = arith.constant 0 : index
    %105 = vector.load %arg9[%c0_62, %c0_63] : memref<2x32xf32, #tpu.memory_space<vmem>>, vector<2x32xf32>
    tpu.vector_store %arg9[%c0_62, %c0_63], %104 {strides = array<i32>} : memref<2x32xf32, #tpu.memory_space<vmem>>, vector<2x32xf32>,
    return
  }
}

</mosaic_0001>

<bundles_post_ra>
// kernel: tpu_custom_call.1
= control target key start
LH: loop header
LB: loop body
LE: loop exit
PB: predicated region body
PF: predicated region fallthrough
CT: control target
= control target key end

     0   :  { %14 = vsyncpa [#allocation3], 0  ;;  %s3114_s0 = inlined_call_operand.vmem [shape: f32[64,32], index: 0, kind: input, shape index: {}]   ;;  %s3115_s1 = inlined_call_operand.vmem [shape: f32[32,768], index: 1, kind: input, shape index: {}]   ;;  %s3116_s2 = inlined_call_operand.hbm [shape: f32[6,32,64], index: 2, kind: input, shape index: {}]   ;;  %s3117_s3 = inlined_call_operand.vmem [shape: f32[1,128], index: 3, kind: input, shape index: {}]   ;;  %s3118_s4 = inlined_call_operand.hbm [shape: f32[7,49,64], index: 4, kind: input, shape index: {}]   ;;  %s3119_s5 = inlined_call_operand.vmem [shape: f32[1,64], index: 5, kind: input, shape index: {}]   ;;  %s3120_s6 = inlined_call_operand.vmem [shape: f32[64,32], index: 6, kind: input, shape index: {}]   ;;  %s3121_s7 = inlined_call_operand.vmem [shape: f32[1,32], index: 7, kind: input, shape index: {}]   ;;  %s3122_s8 = inlined_call_operand.vmem [shape: f32[2], index: 8, kind: input, shape index: {}]   ;;  %s3123_s9 = inlined_call_operand.hbm [shape: f32[2,32], index: 9, kind: output, shape index: {}]  }
   0x1   :  { %15 = vsyncpa [#allocation7], 0 }
   0x2   :  { %16 = vsyncpa [#allocation5], 0 }
   0x3   :  { %17 = vsyncpa [#allocation4], 0  ;;  %s2675_s30 = smov [#allocation2]   ;;  %s2589_s13 = scalar_lea.hbm %s3116_s2, 3072 }
   0x4   :  { %s27_s10 = sshll.u32 %s2675_s30, 4  ;;  %p2590_p0 = scmp.ne.s32.totalorder %s3116_s2, %s2589_s13  ;;  %s28_s10 = int_to_ptr.vmem [resolvable:$true] %s27_s10 }
   0x5   :  { %p2593_p1 = scmp.lt.u32.totalorder %s2589_s13, %s3116_s2 }
   0x7   :  { %p2595_p2 = pnand %p2593_p1, %p2590_p0 }
   0x9   :  { %2598 = shalt.err (!%p2595_p2)
}
   0xa   :  { %s2599_s18 = scalar_lea.vmem %s28_s10, 3072  ;;  %p2604_p4 = scmp.lt.s32.totalorder %s28_s10, %s28_s10 }
   0xb   :  { %p2600_p3 = scmp.ne.s32.totalorder %s28_s10, %s2599_s18  ;;  %p2605_p5 = scmp.lt.s32.totalorder %s2599_s18, %s2599_s18 }
   0xd   :  { %p2606_p6 = por %p2605_p5, %p2604_p4 }
   0xf   :  { %p2607_p7 = pnand %p2606_p6, %p2600_p3 }
  0x11   :  { %2610 = shalt.err (!%p2607_p7)
}
  0x12   :  { %s2676_s19 = smov 128   ;;  %s2677_s20 = smov 8  }
  0x13   :  { %33 = dma.hbm_to_vmem [thread:$0]  %s3116_s2, 3072, %s28_s10, [#allocation3], %s2676_s19, %s2676_s19, %s2677_s20  }
  0x14   :  { %s2678_s23 = smov [#allocation6]   ;;  %s60_s27 = sshll.u32 %s3122_s8, 4  ;;  %s61_s27 = int_to_ptr.vmem [resolvable:$true] %s60_s27 }
  0x15   :  { %s41_s24 = sshll.u32 %s2678_s23, 4  ;;  %s2611_s30 = scalar_lea.hbm %s3118_s4, 6272  ;;  %s42_s24 = int_to_ptr.vmem [resolvable:$true] %s41_s24 }
  0x16   :  { %p2612_p8 = scmp.ne.s32.totalorder %s3118_s4, %s2611_s30  ;;  %p2615_p9 = scmp.lt.u32.totalorder %s2611_s30, %s3118_s4 }
  0x18   :  { %p2617_p10 = pnand %p2615_p9, %p2612_p8 }
  0x1a   :  { %2620 = shalt.err (!%p2617_p10)
}
  0x1b   :  { %s2621_s2 = scalar_lea.vmem %s42_s24, 6272  ;;  %p2626_p12 = scmp.lt.s32.totalorder %s42_s24, %s42_s24 }
  0x1c   :  { %p2622_p11 = scmp.ne.s32.totalorder %s42_s24, %s2621_s2  ;;  %p2627_p13 = scmp.lt.s32.totalorder %s2621_s2, %s2621_s2 }
  0x1e   :  { %p2628_p0 = por %p2627_p13, %p2626_p12 }
  0x20   :  { %p2629_p1 = pnand %p2628_p0, %p2622_p11 }
  0x22   :  { %2632 = shalt.err (!%p2629_p1)
}
  0x23   :  { %47 = dma.hbm_to_vmem [thread:$0]  %s3118_s4, 6272, %s42_s24, [#allocation7], %s2676_s19, %s2676_s19, %s2677_s20  }
  0x24   :  { %s2633_s15 = scalar_lea.vmem %s61_s27, 16  ;;  %p2638_p3 = scmp.lt.s32.totalorder %s61_s27, %s61_s27 }
  0x25   :  { %p2634_p2 = scmp.ne.s32.totalorder %s61_s27, %s2633_s15  ;;  %p2639_p4 = scmp.lt.s32.totalorder %s2633_s15, %s2633_s15 }
  0x27   :  { %p2640_p5 = por %p2639_p4, %p2638_p3 }
  0x29   :  { %p2641_p6 = pnand %p2640_p5, %p2634_p2 }
  0x2b   :  { %2644 = shalt.err (!%p2641_p6)
}
  0x2c   :  { %s2679_s16 = smov [#allocation8]  }
  0x2d   :  { %63 = dma.vmem_to_smem %s61_s27, 16, %s2679_s16, [#allocation5]  }
  0x2e   :  { %2667 = dma.done.wait [#allocation3], 3072  }
  0x2f   :  { %2668 = vsyncadd [#allocation3], 4294964224 }
  0x30   :  { %2669 = dma.done.wait [#allocation7], 6272  }
  0x31   :  { %2670 = vsyncadd [#allocation7], 4294961024 }
  0x32   :  { %2671 = dma.done.wait [#allocation5], 16  }
  0x33   :  { %2672 = vsyncadd [#allocation5], 4294967280 }
  0x34   :  { %73 = sfence }
  0x35   :  { %v85_v0 = vld [vmem:[%s3115_s1 + $0x8] sm:$0xff]  ;;  %v91_v1 = vld [vmem:[%s3115_s1 + $0x38] sm:$0xff]  ;;  %v84_v2 = vld [vmem:[%s3115_s1] sm:$0xff]  ;;  %v2680_v7 = vmov 0.0   ;;  %vm108_vm0 = vcmask 261120   ;;  %vm483_vm1 = vcmask 523264  }
  0x36   :  { %v2343_v3 = vpack.c.bf16 %v91_v1, %v85_v0  ;;  %v90_v4 = vld [vmem:[%s3115_s1 + $0x30] sm:$0xff]  ;;  %v97_v5 = vld [vmem:[%s3115_s1 + $0x68] sm:$0xff]  ;;  %v103_v6 = vld [vmem:[%s3115_s1 + $0x98] sm:$0xff]  ;;  %197 = vmatprep.mubr.f32.mxu0 %v2680_v7  ;;  %233 = vmatprep.mubr.f32.mxu1 %v2680_v7  ;;  %vm1162_vm4 = vcmask 1040384   ;;  %vm2682_vm5 = vmmov 0   ;;  %vm1157_vm8 = vcmask 1041409  }
  0x37   :  { %v2345_v8 = vpack.c.bf16 %v90_v4, %v84_v2  ;;  %v2347_v9 = vpack.c.bf16 %v103_v6, %v97_v5  ;;  %v96_v10 = vld [vmem:[%s3115_s1 + $0x60] sm:$0xff]  ;;  %v102_v11 = vld [vmem:[%s3115_s1 + $0x90] sm:$0xff]  ;;  %v87_v13 = vld [vmem:[%s3115_s1 + $0x18] sm:$0xff]  ;;  %vm1159_vm9 = vcmask 400384   ;;  %s1869_s25 = sld [smem:[#allocation8 + $0x1]]  ;;  %vm1850_vm11 = vcmask 254976  }
  0x38   :  { %2344 = vmatprep.subr.bf16.mxu0 %v2343_v3  ;;  %2538 = vmatprep.subr.bf16.mxu1 %v2343_v3  ;;  %v2349_v12 = vpack.c.bf16 %v102_v11, %v96_v10  ;;  %v93_v14 = vld [vmem:[%s3115_s1 + $0x48] sm:$0xff]  ;;  %v86_v15 = vld [vmem:[%s3115_s1 + $0x10] sm:$0xff]  ;;  %v92_v17 = vld [vmem:[%s3115_s1 + $0x40] sm:$0xff] }
  0x39   :  { %2346 = vmatpush1.bf16.msra.mxu0 %v2345_v8  ;;  %2540 = vmatpush1.bf16.msra.mxu1 %v2345_v8  ;;  %v2351_v16 = vpack.c.bf16 %v93_v14, %v87_v13  ;;  %v99_v18 = vld [vmem:[%s3115_s1 + $0x78] sm:$0xff]  ;;  %v76_v19 = vld [vmem:[%s3114_s0] sm:$0xff]  ;;  %v105_v20 = vld [vmem:[%s3115_s1 + $0xa8] sm:$0xff]  ;;  %v2353_v22 = vpack.c.bf16 %v92_v17, %v86_v15 }
  0x3a   :  { %2348 = vmatprep.subr.bf16.mxu0 %v2347_v9  ;;  %2539 = vmatprep.subr.bf16.mxu1 %v2347_v9  ;;  %v2812_v21 = vld [vmem:[%s3114_s0 + $0x30] sm:$0xff]  ;;  %v89_v23 = vld [vmem:[%s3115_s1 + $0x28] sm:$0xff]  ;;  %v95_v24 = vld [vmem:[%s3115_s1 + $0x58] sm:$0xff]  ;;  %v2355_v25 = vpack.c.bf16 %v105_v20, %v99_v18 }
  0x3b   :  { %v98_v26 = vld [vmem:[%s3115_s1 + $0x70] sm:$0xff]  ;;  %v104_v27 = vld [vmem:[%s3115_s1 + $0xa0] sm:$0xff]  ;;  %v2359_v28 = vpack.c.bf16 %v95_v24, %v89_v23  ;;  %v101_v31 = vld [vmem:[%s3115_s1 + $0x88] sm:$0xff] }
  0x3c   :  { %v88_v29 = vld [vmem:[%s3115_s1 + $0x20] sm:$0xff]  ;;  %v94_v30 = vld [vmem:[%s3115_s1 + $0x50] sm:$0xff]  ;;  %v107_v32 = vld [vmem:[%s3115_s1 + $0xb8] sm:$0xff]  ;;  %v2357_v35 = vpack.c.bf16 %v104_v27, %v98_v26 }
  0x3d   :  { %2350 = vmatpush1.bf16.msra.mxu0 %v2349_v12  ;;  %2541 = vmatpush1.bf16.msra.mxu1 %v2349_v12  ;;  %v77_v33 = vld [vmem:[%s3114_s0 + $0x8] sm:$0xff]  ;;  %v83_v34 = vld [vmem:[%s3114_s0 + $0x38] sm:$0xff]  ;;  %v2361_v36 = vpack.c.bf16 %v94_v30, %v88_v29  ;;  %v2363_v37 = vpack.c.bf16 %v107_v32, %v101_v31  ;;  %v100_v38 = vld [vmem:[%s3115_s1 + $0x80] sm:$0xff] }
  0x3e   :  { %2352 = vmatprep.subr.bf16.mxu1 %v2351_v16  ;;  %2360 = vmatprep.subr.bf16.mxu0 %v2359_v28  ;;  %v106_v39 = vld [vmem:[%s3115_s1 + $0xb0] sm:$0xff]  ;;  %v79_v42 = vld [vmem:[%s3114_s0 + $0x18] sm:$0xff]  ;;  %v80_v43 = vld [vmem:[%s3114_s0 + $0x20] sm:$0xff] }
  0x3f   :  { %v78_v40 = vld [vmem:[%s3114_s0 + $0x10] sm:$0xff]  ;;  %v2365_v41 = vpack.c.bf16 %v106_v39, %v100_v38  ;;  %v81_v44 = vld [vmem:[%s3114_s0 + $0x28] sm:$0xff]  ;;  %v479_v45 = vld [vmem:[#allocation2] sm:$0xff]  ;;  %s74_s0 = sld [smem:[#allocation8]] }
  0x40   :  { %1870 = vmatmul.mubr.msk.f32.vlgmr.msra.gmra.mrb[0].mxu0 %vm108_vm0, %v76_v19  ;;  %1876 = vmatmul.mubr.msk.f32.vlgmr.msra.gmra.mrb[0].mxu1 %vm108_vm0, %v2812_v21  ;;  %v480_v23 = vld [vmem:[#allocation2 + $0x8] sm:$0xff]  ;;  %v481_v26 = vld [vmem:[#allocation2 + $0x10] sm:$0xff] }
  0x41   :  { %203 = vmatprep.mubr.f32.mxu0 %v2680_v7  ;;  %2354 = vmatpush1.bf16.msra.mxu1 %v2353_v22 }
  0x42   :  { %239 = vmatprep.mubr.f32.mxu1 %v2680_v7  ;;  %2356 = vmatprep.subr.bf16.mxu1 %v2355_v25 }
  0x43   :  { %2362 = vmatpush1.bf16.msra.mxu0 %v2361_v36  ;;  %v586_v36 = vld [vmem:[#allocation2 + $0x20] sm:$0xff] }
  0x44   :  { %1871 = vmatmul.mubr.msk.f32.gmra.mrb[2].mxu0 %vm108_vm0, %v77_v33  ;;  %1877 = vmatmul.mubr.msk.f32.gmra.mrb[2].mxu1 %vm108_vm0, %v83_v34 }
  0x45   :  { %209 = vmatprep.mubr.f32.mxu0 %v2680_v7  ;;  %2358 = vmatpush1.bf16.msra.mxu1 %v2357_v35 }
  0x46   :  { %310 = vmatprep.mubr.f32.mxu1 %v2680_v7  ;;  %2364 = vmatprep.subr.bf16.mxu0 %v2363_v37 }
  0x47   :  { %2366 = vmatpush1.bf16.msra.mxu0 %v2365_v41 }
  0x48   :  { %1872 = vmatmul.mubr.msk.f32.gmra.mrb[4].mxu0 %vm108_vm0, %v78_v40  ;;  %1878 = vmatmul.mubr.msk.f32.vlgmr.msra.gmra.mrb[4].mxu1 %vm108_vm0, %v76_v19 }
  0x49   :  { %215 = vmatprep.mubr.f32.mxu0 %v2680_v7  ;;  %316 = vmatprep.mubr.f32.mxu1 %v2680_v7 }
  0x4c   :  { %1873 = vmatmul.mubr.msk.f32.gmra.mrb[6].mxu0 %vm108_vm0, %v79_v42  ;;  %1879 = vmatmul.mubr.msk.f32.gmra.mrb[6].mxu1 %vm108_vm0, %v77_v33 }
  0x4d   :  { %221 = vmatprep.mubr.f32.mxu0 %v2680_v7  ;;  %322 = vmatprep.mubr.f32.mxu1 %v2680_v7 }
  0x50   :  { %1874 = vmatmul.mubr.msk.f32.gmra.mrb[8].mxu0 %vm108_vm0, %v80_v43  ;;  %1880 = vmatmul.mubr.msk.f32.gmra.mrb[8].mxu1 %vm108_vm0, %v78_v40 }
  0x51   :  { %227 = vmatprep.mubr.f32.mxu0 %v2680_v7  ;;  %328 = vmatprep.mubr.f32.mxu1 %v2680_v7 }
  0x54   :  { %1875 = vmatmul.mubr.msk.f32.gmra.mrb[10].mxu0 %vm108_vm0, %v81_v44  ;;  %1881 = vmatmul.mubr.msk.f32.gmra.mrb[10].mxu1 %vm108_vm0, %v79_v42 }
  0x55   :  { %334 = vmatprep.mubr.f32.mxu1 %v2680_v7  ;;  %423 = vmatprep.mubr.f32.mxu0 %v2680_v7 }
  0x58   :  { %1882 = vmatmul.mubr.msk.f32.gmra.mrb[12].mxu1 %vm108_vm0, %v80_v43  ;;  %1886 = vmatmul.mubr.msk.f32.vlgmr.msra.gmra.mrb[12].mxu0 %vm108_vm0, %v76_v19 }
  0x59   :  { %340 = vmatprep.mubr.f32.mxu1 %v2680_v7  ;;  %429 = vmatprep.mubr.f32.mxu0 %v2680_v7 }
  0x5c   :  { %1883 = vmatmul.mubr.msk.f32.gmra.mrb[14].mxu1 %vm108_vm0, %v81_v44  ;;  %1887 = vmatmul.mubr.msk.f32.gmra.mrb[14].mxu0 %vm108_vm0, %v77_v33  ;;  %v482_v33 = vld [vmem:[#allocation2 + $0x18] sm:$0xff] }
  0x5d   :  { %346 = vmatprep.mubr.f32.mxu1 %v2680_v7  ;;  %435 = vmatprep.mubr.f32.mxu0 %v2680_v7 }
  0x60   :  { %1884 = vmatmul.mubr.msk.f32.gmra.mrb[16].mxu1 %vm108_vm0, %v2812_v21  ;;  %1888 = vmatmul.mubr.msk.f32.gmra.mrb[16].mxu0 %vm108_vm0, %v78_v40 }
  0x61   :  { %352 = vmatprep.mubr.f32.mxu1 %v2680_v7  ;;  %441 = vmatprep.mubr.f32.mxu0 %v2680_v7 }
  0x64   :  { %1885 = vmatmul.mubr.msk.f32.gmra.mrb[18].mxu1 %vm108_vm0, %v83_v34  ;;  %1889 = vmatmul.mubr.msk.f32.gmra.mrb[18].mxu0 %vm108_vm0, %v79_v42 }
  0x65   :  { %447 = vmatprep.mubr.f32.mxu0 %v2680_v7  ;;  %2089 = vmatprep.mubr.msk.f32.mxu1 %vm483_vm1, %v479_v45 }
  0x68   :  { %1890 = vmatmul.mubr.msk.f32.gmra.mrb[20].mxu0 %vm108_vm0, %v80_v43 }
  0x69   :  { %453 = vmatprep.mubr.f32.mxu0 %v2680_v7 }
  0x6c   :  { %1891 = vmatmul.mubr.msk.f32.gmra.mrb[22].mxu0 %vm108_vm0, %v81_v44 }
  0x6d   :  { %459 = vmatprep.mubr.f32.mxu0 %v2680_v7 }
  0x70   :  { %1892 = vmatmul.mubr.msk.f32.gmra.mrb[24].mxu0 %vm108_vm0, %v2812_v21 }
  0x71   :  { %465 = vmatprep.mubr.f32.mxu0 %v2680_v7 }
  0x74   :  { %1893 = vmatmul.mubr.msk.f32.gmra.mrb[26].mxu0 %vm108_vm0, %v83_v34 }
  0x75   :  { %2219 = vmatprep.mubr.msk.f32.mxu0 %vm2682_vm5, %v2680_v7 }
 0x113   :  { %v199_v46 = vpop.f32.mrb[0].mxu0  ;;  %v235_v47 = vpop.f32.mrb[0].mxu1 }
 0x114   :  { %v201_v48 = vpop.f32.mrb[1].mxu0  ;;  %v237_v49 = vpop.f32.mrb[1].mxu1 }
 0x117   :  { %v205_v50 = vpop.f32.mrb[2].mxu0  ;;  %v241_v51 = vpop.f32.mrb[2].mxu1 }
 0x118   :  { %v2367_v52 = vpack.c.bf16 %v205_v50, %v199_v46  ;;  %v207_v53 = vpop.f32.mrb[3].mxu0  ;;  %v2379_v54 = vpack.c.bf16 %v241_v51, %v235_v47  ;;  %v243_v55 = vpop.f32.mrb[3].mxu1  ;;  %v588_v51 = vld [vmem:[#allocation2 + $0x30] sm:$0xff] }
 0x119   :  { %v2383_v56 = vpack.c.bf16 %v207_v53, %v201_v48  ;;  %v2912_v57 = vpack.c.bf16 %v243_v55, %v237_v49  ;;  %v587_v49 = vld [vmem:[#allocation2 + $0x28] sm:$0xff]  ;;  %v589_v55 = vld [vmem:[#allocation2 + $0x38] sm:$0xff] }
 0x11a   :  { %2368 = vmatprep.subr.bf16.mxu1 %v2367_v52 }
 0x11b   :  { %v211_v58 = vpop.f32.mrb[4].mxu0  ;;  %2370 = vmatpush3.bf16.msra.mxu1 %v2367_v52  ;;  %v312_v59 = vpop.f32.mrb[4].mxu1 }
 0x11c   :  { %v213_v60 = vpop.f32.mrb[5].mxu0  ;;  %v314_v61 = vpop.f32.mrb[5].mxu1 }
 0x11f   :  { %v217_v62 = vpop.f32.mrb[6].mxu0  ;;  %v318_v63 = vpop.f32.mrb[6].mxu1 }
 0x120   :  { %v2371_v0 = vpack.c.bf16 %v217_v62, %v211_v58  ;;  %v219_v1 = vpop.f32.mrb[7].mxu0  ;;  %v2914_v2 = vpack.c.bf16 %v318_v63, %v312_v59  ;;  %v320_v3 = vpop.f32.mrb[7].mxu1  ;;  %v693_v63 = vld [vmem:[#allocation2 + $0x48] sm:$0xff] }
 0x121   :  { %v2387_v4 = vpack.c.bf16 %v219_v1, %v213_v60  ;;  %v2916_v5 = vpack.c.bf16 %v320_v3, %v314_v61  ;;  %v695_v1 = vld [vmem:[#allocation2 + $0x58] sm:$0xff]  ;;  %v799_v3 = vld [vmem:[#allocation2 + $0x68] sm:$0xff] }
 0x122   :  { %2372 = vmatprep.subr.bf16.mxu1 %v2371_v0 }
 0x123   :  { %v223_v6 = vpop.f32.mrb[8].mxu0  ;;  %2374 = vmatpush3.bf16.msra.mxu1 %v2371_v0  ;;  %v324_v8 = vpop.f32.mrb[8].mxu1  ;;  %v694_v0 = vld [vmem:[#allocation2 + $0x50] sm:$0xff] }
 0x124   :  { %v225_v9 = vpop.f32.mrb[9].mxu0  ;;  %v326_v10 = vpop.f32.mrb[9].mxu1 }
 0x127   :  { %v229_v11 = vpop.f32.mrb[10].mxu0  ;;  %v330_v12 = vpop.f32.mrb[10].mxu1 }
 0x128   :  { %v2375_v13 = vpack.c.bf16 %v229_v11, %v223_v6  ;;  %v231_v14 = vpop.f32.mrb[11].mxu0  ;;  %v2918_v15 = vpack.c.bf16 %v330_v12, %v324_v8  ;;  %v332_v16 = vpop.f32.mrb[11].mxu1  ;;  %v904_v6 = vld [vmem:[#allocation2 + $0x80] sm:$0xff]  ;;  %v905_v8 = vld [vmem:[#allocation2 + $0x88] sm:$0xff] }
 0x129   :  { %v2391_v17 = vpack.c.bf16 %v231_v14, %v225_v9  ;;  %v2920_v18 = vpack.c.bf16 %v332_v16, %v326_v10  ;;  %v906_v9 = vld [vmem:[#allocation2 + $0x90] sm:$0xff]  ;;  %v907_v10 = vld [vmem:[#allocation2 + $0x98] sm:$0xff]  ;;  %v1010_v11 = vld [vmem:[#allocation2 + $0xa0] sm:$0xff] }
 0x12a   :  { %2376 = vmatprep.subr.bf16.mxu1 %v2375_v13  ;;  %v1011_v12 = vld [vmem:[#allocation2 + $0xa8] sm:$0xff]  ;;  %v1013_v14 = vld [vmem:[#allocation2 + $0xb8] sm:$0xff] }
 0x12b   :  { %2378 = vmatpush3.bf16.msra.mxu1 %v2375_v13  ;;  %v336_v19 = vpop.f32.mrb[12].mxu1  ;;  %v425_v20 = vpop.f32.mrb[12].mxu0  ;;  %v1012_v13 = vld [vmem:[#allocation2 + $0xb0] sm:$0xff]  ;;  %v1148_v16 = vld [vmem:[#allocation6 + $0x8] sm:$0xff] }
 0x12c   :  { %2380 = vmatprep.subr.bf16.mxu1 %v2379_v54  ;;  %v338_v21 = vpop.f32.mrb[13].mxu1  ;;  %v427_v22 = vpop.f32.mrb[13].mxu0 }
 0x12f   :  { %2382 = vmatpush3.bf16.msra.mxu1 %v2379_v54  ;;  %v342_v24 = vpop.f32.mrb[14].mxu1  ;;  %v431_v25 = vpop.f32.mrb[14].mxu0 }
 0x130   :  { %2384 = vmatprep.subr.bf16.mxu1 %v2383_v56  ;;  %v2407_v27 = vpack.c.bf16 %v342_v24, %v336_v19  ;;  %v344_v28 = vpop.f32.mrb[15].mxu1  ;;  %v2922_v29 = vpack.c.bf16 %v431_v25, %v425_v20  ;;  %v433_v30 = vpop.f32.mrb[15].mxu0  ;;  %v1150_v20 = vld [vmem:[#allocation6 + $0x18] sm:$0xff]  ;;  %v1894_v25 = vld [vmem:[%s3117_s3] ss:$0 sm:$0xff]  ;;  %s2683_s3 = smov 79  }
 0x131   :  { %v2924_v31 = vpack.c.bf16 %v344_v28, %v338_v21  ;;  %v2926_v32 = vpack.c.bf16 %v433_v30, %v427_v22  ;;  %v1151_v22 = vld [vmem:[#allocation6 + $0x20] sm:$0xff] }
 0x132   :  { %2090 = vmatmul.mubr.msk.f32.vlgmr.msra.gmra.mrb[20].mxu1 %vm483_vm1, %v480_v23  ;;  %v1152_v23 = vld [vmem:[#allocation6 + $0x28] sm:$0xff] }
 0x133   :  { %2386 = vmatpush3.bf16.msra.mxu1 %v2383_v56  ;;  %2092 = vmatprep.mubr.msk.f32.mxu1 %vm483_vm1, %v481_v26  ;;  %v348_v34 = vpop.f32.mrb[16].mxu1  ;;  %v437_v35 = vpop.f32.mrb[16].mxu0  ;;  %v2470_v24 = vpack.c.bf16 %v1152_v23, %v1151_v22  ;;  %v1328_v23 = vld [vmem:[#allocation6 + $0x90] sm:$0xff] }
 0x134   :  { %2388 = vmatprep.subr.bf16.mxu1 %v2387_v4  ;;  %v350_v37 = vpop.f32.mrb[17].mxu1  ;;  %v439_v38 = vpop.f32.mrb[17].mxu0 }
 0x136   :  { %2093 = vmatmul.mubr.msk.f32.gmra.mrb[22].mxu1 %vm483_vm1, %v482_v33 }
 0x137   :  { %2390 = vmatpush3.bf16.msra.mxu1 %v2387_v4  ;;  %2111 = vmatprep.mubr.msk.f32.mxu1 %vm483_vm1, %v586_v36  ;;  %v354_v39 = vpop.f32.mrb[18].mxu1  ;;  %v443_v40 = vpop.f32.mrb[18].mxu0  ;;  %v800_v4 = vld [vmem:[#allocation2 + $0x70] sm:$0xff] }
 0x138   :  { %2392 = vmatprep.subr.bf16.mxu1 %v2391_v17  ;;  %v2411_v41 = vpack.c.bf16 %v354_v39, %v348_v34  ;;  %v356_v42 = vpop.f32.mrb[19].mxu1  ;;  %v2435_v43 = vpack.c.bf16 %v443_v40, %v437_v35  ;;  %v445_v44 = vpop.f32.mrb[19].mxu0  ;;  %v1153_v34 = vld [vmem:[#allocation6 + $0x30] sm:$0x1] }
 0x139   :  { %v2427_v45 = vpack.c.bf16 %v356_v42, %v350_v37  ;;  %v2932_v46 = vpack.c.bf16 %v445_v44, %v439_v38 }
 0x13b   :  { %2394 = vmatpush3.bf16.msra.mxu1 %v2391_v17  ;;  %v449_v47 = vpop.f32.mrb[20].mxu0  ;;  %v1149_v17 = vld [vmem:[#allocation6 + $0x10] sm:$0xff] }
 0x13c   :  { %2396 = vmatprep.subr.bf16.mxu1 %v2912_v57  ;;  %v451_v48 = vpop.f32.mrb[21].mxu0  ;;  %v2467_v21 = vpack.c.bf16 %v1150_v20, %v1149_v17  ;;  %v1327_v20 = vld [vmem:[#allocation6 + $0x88] sm:$0xff] }
 0x13f   :  { %2398 = vmatpush3.bf16.msra.mxu1 %v2912_v57  ;;  %v455_v50 = vpop.f32.mrb[22].mxu0  ;;  %v692_v57 = vld [vmem:[#allocation2 + $0x40] sm:$0xff] }
 0x140   :  { %2400 = vmatprep.subr.bf16.mxu1 %v2914_v2  ;;  %v2439_v52 = vpack.c.bf16 %v455_v50, %v449_v47  ;;  %v457_v53 = vpop.f32.mrb[23].mxu0  ;;  %v1763_v47 = vld [vmem:[%s3120_s6 + $0x8] sm:$0xff]  ;;  %v1765_v50 = vld [vmem:[%s3120_s6 + $0x18] sm:$0xff] }
 0x141   :  { %v2937_v54 = vpack.c.bf16 %v457_v53, %v451_v48  ;;  %v1764_v48 = vld [vmem:[%s3120_s6 + $0x10] sm:$0xff]  ;;  %v1767_v53 = vld [vmem:[%s3120_s6 + $0x28] sm:$0xff] }
 0x142   :  { %2112 = vmatmul.mubr.msk.f32.vlgmr.msra.gmra.mrb[20].mxu1 %vm483_vm1, %v587_v49 }
 0x143   :  { %2402 = vmatpush3.bf16.msra.mxu1 %v2914_v2  ;;  %2114 = vmatprep.mubr.msk.f32.mxu1 %vm483_vm1, %v588_v51  ;;  %v461_v56 = vpop.f32.mrb[24].mxu0  ;;  %v798_v2 = vld [vmem:[#allocation2 + $0x60] sm:$0xff]  ;;  %v2530_v51 = vpack.c.bf16 %v1765_v50, %v1764_v48  ;;  %v1503_v50 = vld [vmem:[#allocation6 + $0x108] sm:$0xff] }
 0x144   :  { %2404 = vmatprep.subr.bf16.mxu1 %v2918_v15  ;;  %v463_v58 = vpop.f32.mrb[25].mxu0 }
 0x146   :  { %2115 = vmatmul.mubr.msk.f32.gmra.mrb[22].mxu1 %vm483_vm1, %v589_v55 }
 0x147   :  { %2406 = vmatpush3.bf16.msra.mxu1 %v2918_v15  ;;  %2133 = vmatprep.mubr.msk.f32.mxu1 %vm483_vm1, %v692_v57  ;;  %v467_v59 = vpop.f32.mrb[26].mxu0  ;;  %v1147_v15 = vld [vmem:[#allocation6] sm:$0xff]  ;;  %v1238_v57 = vld [vmem:[#allocation6 + $0x38] sm:$0xff] }
 0x148   :  { %2408 = vmatprep.subr.bf16.mxu1 %v2407_v27  ;;  %v2443_v60 = vpack.c.bf16 %v467_v59, %v461_v56  ;;  %v469_v61 = vpop.f32.mrb[27].mxu0  ;;  %v2464_v19 = vpack.c.bf16 %v1148_v16, %v1147_v15  ;;  %v1244_v16 = vld [vmem:[#allocation6 + $0x68] sm:$0x1] }
 0x149   :  { %v2459_v62 = vpack.c.bf16 %v469_v61, %v463_v58  ;;  %v1239_v58 = vld [vmem:[#allocation6 + $0x40] sm:$0xff] }
 0x14b   :  { %2410 = vmatpush3.bf16.msra.mxu1 %v2407_v27  ;;  %v1119_v27 = vstv %s74_s0 }
 0x14c   :  { %2412 = vmatprep.subr.bf16.mxu1 %v2411_v41 }
 0x14f   :  { %2414 = vmatpush3.bf16.msra.mxu1 %v2411_v41 }
 0x150   :  { %2416 = vmatprep.subr.bf16.mxu1 %v2916_v5 }
 0x152   :  { %2134 = vmatmul.mubr.msk.f32.vlgmr.msra.gmra.mrb[20].mxu1 %vm483_vm1, %v693_v63  ;;  %v1240_v63 = vld [vmem:[#allocation6 + $0x48] sm:$0xff] }
 0x153   :  { %2418 = vmatpush3.bf16.msra.mxu1 %v2916_v5  ;;  %2136 = vmatprep.mubr.msk.f32.mxu1 %vm483_vm1, %v694_v0  ;;  %v801_v5 = vld [vmem:[#allocation2 + $0x78] sm:$0xff]  ;;  %v1241_v0 = vld [vmem:[#allocation6 + $0x50] sm:$0xff] }
 0x154   :  { %2420 = vmatprep.subr.bf16.mxu1 %v2920_v18 }
 0x156   :  { %2137 = vmatmul.mubr.msk.f32.gmra.mrb[22].mxu1 %vm483_vm1, %v695_v1 }
 0x157   :  { %2422 = vmatpush3.bf16.msra.mxu1 %v2920_v18  ;;  %2155 = vmatprep.mubr.msk.f32.mxu1 %vm483_vm1, %v798_v2  ;;  %v2681_v18 = vmov 0.0|0.0  }
 0x158   :  { %2424 = vmatprep.subr.bf16.mxu1 %v2924_v31  ;;  %2463 = vmatprep.subr.bf16.mxu0 %v2681_v18 }
 0x159   :  { %2465 = vmatpush3.bf16.msra.mxu0 %v2464_v19  ;;  %v1326_v19 = vld [vmem:[#allocation6 + $0x80] sm:$0xff] }
 0x15a   :  { %2466 = vmatprep.subr.bf16.mxu0 %v2681_v18  ;;  %v2485_v22 = vpack.c.bf16 %v1327_v20, %v1326_v19 }
 0x15b   :  { %2426 = vmatpush3.bf16.msra.mxu1 %v2924_v31 }
 0x15c   :  { %2428 = vmatprep.subr.bf16.mxu1 %v2427_v45 }
 0x15d   :  { %2468 = vmatpush3.bf16.msra.mxu0 %v2467_v21 }
 0x15e   :  { %2469 = vmatprep.subr.bf16.mxu0 %v2681_v18 }
 0x15f   :  { %2430 = vmatpush3.bf16.msra.mxu1 %v2427_v45 }
 0x160   :  { %2432 = vmatprep.subr.bf16.mxu1 %v2922_v29 }
 0x161   :  { %2471 = vmatpush3.bf16.msra.mxu0 %v2470_v24  ;;  %v1329_v24 = vld [vmem:[#allocation6 + $0x98] sm:$0xff] }
 0x162   :  { %2156 = vmatmul.mubr.msk.f32.vlgmr.msra.gmra.mrb[20].mxu1 %vm483_vm1, %v799_v3  ;;  %2217 = vmatprep.subr.mxu0 %v2680_v7 }
 0x163   :  { %2434 = vmatpush3.bf16.msra.mxu1 %v2922_v29  ;;  %2158 = vmatprep.mubr.msk.f32.mxu1 %vm483_vm1, %v800_v4 }
 0x164   :  { %2436 = vmatprep.subr.bf16.mxu1 %v2435_v43 }
 0x165   :  { %2218 = vmatpush3.msk.msra.mxu0 %vm1162_vm4, %v1153_v34 }
 0x166   :  { %2159 = vmatmul.mubr.msk.f32.gmra.mrb[22].mxu1 %vm483_vm1, %v801_v5  ;;  %2472 = vmatprep.subr.bf16.mxu0 %v2681_v18 }
 0x167   :  { %2438 = vmatpush3.bf16.msra.mxu1 %v2435_v43  ;;  %2177 = vmatprep.mubr.msk.f32.mxu1 %vm483_vm1, %v904_v6  ;;  %v2476_v6 = vpack.c.bf16 %v1241_v0, %v1240_v63 }
 0x168   :  { %2440 = vmatprep.subr.bf16.mxu1 %v2439_v52 }
 0x16b   :  { %2442 = vmatpush3.bf16.msra.mxu1 %v2439_v52  ;;  %v1766_v52 = vld [vmem:[%s3120_s6 + $0x20] sm:$0xff] }
 0x16c   :  { %2444 = vmatprep.subr.bf16.mxu1 %v2443_v60 }
 0x16f   :  { %2446 = vmatpush3.bf16.msra.mxu1 %v2443_v60 }
 0x170   :  { %2448 = vmatprep.subr.bf16.mxu1 %v2926_v32 }
 0x172   :  { %2178 = vmatmul.mubr.msk.f32.vlgmr.msra.gmra.mrb[20].mxu1 %vm483_vm1, %v905_v8  ;;  %v1242_v8 = vld [vmem:[#allocation6 + $0x58] sm:$0xff] }
 0x173   :  { %2450 = vmatpush3.bf16.msra.mxu1 %v2926_v32  ;;  %2180 = vmatprep.mubr.msk.f32.mxu1 %vm483_vm1, %v906_v9  ;;  %v1243_v9 = vld [vmem:[#allocation6 + $0x60] sm:$0xff] }
 0x174   :  { %2452 = vmatprep.subr.bf16.mxu1 %v2932_v46 }
 0x176   :  { %2181 = vmatmul.mubr.msk.f32.gmra.mrb[22].mxu1 %vm483_vm1, %v907_v10 }
 0x177   :  { %2454 = vmatpush3.bf16.msra.mxu1 %v2932_v46  ;;  %2199 = vmatprep.mubr.msk.f32.mxu1 %vm483_vm1, %v1010_v11  ;;  %v1762_v46 = vld [vmem:[%s3120_s6] sm:$0xff] }
 0x178   :  { %2456 = vmatprep.subr.bf16.mxu1 %v2937_v54  ;;  %v2527_v49 = vpack.c.bf16 %v1763_v47, %v1762_v46  ;;  %v1501_v46 = vld [vmem:[#allocation6 + $0xf8] sm:$0xff] }
 0x17b   :  { %2458 = vmatpush3.bf16.msra.mxu1 %v2937_v54  ;;  %v2533_v54 = vpack.c.bf16 %v1767_v53, %v1766_v52  ;;  %v1585_v52 = vld [vmem:[#allocation6 + $0x118] sm:$0xff]  ;;  %v1586_v53 = vld [vmem:[#allocation6 + $0x120] sm:$0xff] }
 0x17c   :  { %2460 = vmatprep.subr.bf16.mxu1 %v2459_v62 }
 0x17f   :  { %2462 = vmatpush3.bf16.msra.mxu1 %v2459_v62  ;;  %v2473_v62 = vpack.c.bf16 %v1239_v58, %v1238_v57  ;;  %v2509_v58 = vpack.c.bf16 %v1586_v53, %v1585_v52 }
 0x180   :  { %2526 = vmatprep.subr.bf16.mxu1 %v2681_v18 }
 0x182   :  { %2200 = vmatmul.mubr.msk.f32.vlgmr.msra.gmra.mrb[20].mxu1 %vm483_vm1, %v1011_v12  ;;  %v2479_v12 = vpack.c.bf16 %v1243_v9, %v1242_v8  ;;  %v1676_v9 = vld [vmem:[#allocation6 + $0x170] sm:$0xff] }
 0x183   :  { %2202 = vmatprep.mubr.msk.f32.mxu1 %vm483_vm1, %v1012_v13  ;;  %2528 = vmatpush3.bf16.msra.mxu1 %v2527_v49  ;;  %v1324_v13 = vld [vmem:[#allocation6 + $0x70] sm:$0xff]  ;;  %v1502_v49 = vld [vmem:[#allocation6 + $0x100] sm:$0xff] }
 0x184   :  { %2529 = vmatprep.subr.bf16.mxu1 %v2681_v18 }
 0x186   :  { %2203 = vmatmul.mubr.msk.f32.gmra.mrb[22].mxu1 %vm483_vm1, %v1013_v14  ;;  %v1325_v14 = vld [vmem:[#allocation6 + $0x78] sm:$0xff] }
 0x187   :  { %2340 = vmatprep.mubr.msk.f32.mxu1 %vm2682_vm5, %v2680_v7  ;;  %2531 = vmatpush3.bf16.msra.mxu1 %v2530_v51  ;;  %v2482_v17 = vpack.c.bf16 %v1325_v14, %v1324_v13  ;;  %v2506_v51 = vpack.c.bf16 %v1503_v50, %v1502_v49  ;;  %v1678_v14 = vld [vmem:[#allocation6 + $0x180] sm:$0x1] }
 0x188   :  { %2532 = vmatprep.subr.bf16.mxu1 %v2681_v18 }
 0x18b   :  { %2534 = vmatpush3.bf16.msra.mxu1 %v2533_v54 }
 0x18c   :  { %2535 = vmatprep.subr.bf16.mxu1 %v2681_v18 }
 0x255   :  { %v2201_v26 = vpop.f32.mrb[20].mxu1 }
 0x256   :  { %v2542_v28 = vadd.f32 %v2201_v26, %v1894_v25  ;;  %v1092_v29 = vpop.f32.mrb[21].mxu1  ;;  %v1411_v26 = vld [vmem:[#allocation6 + $0xa8] sm:$0xff] }
 0x257   :  { %v2543_v30 = vadd.f32 %v1894_v25, %v1092_v29  ;;  %v1330_v29 = vld [vmem:[#allocation6 + $0xa0] sm:$0x1] }
 0x258   :  { %vm1116_vm2 = vcmp.gt.f32.partialorder %v2542_v28, 0.0  ;;  %v1121_v31 = vmul.f32 %v2542_v28, %v1119_v27 }
 0x259   :  { %vm1115_vm3 = vcmp.gt.f32.partialorder %v2543_v30, 0.0  ;;  %v1120_v32 = vmul.f32 %v2543_v30, %v1119_v27  ;;  %v2204_v33 = vpop.f32.mrb[22].mxu1 }
 0x25a   :  { %v2544_v35 = vadd.f32 %v2204_v33, %v1894_v25  ;;  %v1102_v36 = vpop.f32.mrb[23].mxu1  ;;  %v1125_v37 = vsel %vm1116_vm2, %v2542_v28, %v1121_v31  ;;  %v1414_v33 = vld [vmem:[#allocation6 + $0xc0] sm:$0xff] }
 0x25b   :  { %v2545_v38 = vadd.f32 %v1894_v25, %v1102_v36  ;;  %v1124_v39 = vsel %vm1115_vm3, %v2543_v30, %v1120_v32  ;;  %v2488_v25 = vpack.c.bf16 %v1329_v24, %v1328_v23  ;;  %v1413_v32 = vld [vmem:[#allocation6 + $0xb8] sm:$0xff]  ;;  %v1415_v36 = vld [vmem:[#allocation6 + $0xc8] sm:$0xff] }
 0x25c   :  { %v1123_v40 = vmul.f32 %v2544_v35, %v1119_v27  ;;  %vm1118_vm6 = vcmp.gt.f32.partialorder %v2544_v35, 0.0  ;;  %v1128_v41 = vmax.f32 %v1124_v39, %v1125_v37  ;;  %v1416_v37 = vld [vmem:[#allocation6 + $0xd0] sm:$0xff]  ;;  %v1498_v39 = vld [vmem:[#allocation6 + $0xe0] sm:$0xff] }
 0x25d   :  { %v1122_v42 = vmul.f32 %v2545_v38, %v1119_v27  ;;  %vm1117_vm7 = vcmp.gt.f32.partialorder %v2545_v38, 0.0  ;;  %v1412_v27 = vld [vmem:[#allocation6 + $0xb0] sm:$0xff] }
 0x25e   :  { %v1127_v43 = vsel %vm1118_vm6, %v2544_v35, %v1123_v40  ;;  %v2491_v31 = vpack.c.bf16 %v1412_v27, %v1411_v26  ;;  %v2494_v35 = vpack.c.bf16 %v1414_v33, %v1413_v32  ;;  %v1499_v40 = vld [vmem:[#allocation6 + $0xe8] sm:$0xff] }
 0x25f   :  { %v1126_v44 = vsel %vm1117_vm7, %v2545_v38, %v1122_v42  ;;  %v2497_v38 = vpack.c.bf16 %v1416_v37, %v1415_v36  ;;  %v1417_v42 = vld [vmem:[#allocation6 + $0xd8] sm:$0x1] }
 0x260   :  { %v1129_v45 = vmax.f32 %v1126_v44, %v1127_v43  ;;  %v2500_v44 = vpack.c.bf16 %v1499_v40, %v1498_v39 }
 0x262   :  { %1134 = vrot.lane.b32.xlu0 %v1129_v45, %s2683_s3 }
 0x266   :  { %1132 = vrot.lane.b32.xlu0 %v1128_v41, %s2683_s3 }
 0x2d4   :  { %v1135_v55 = vpop.permute.xlu0 %1134 }
 0x2d5   :  { %v3010_v56 = vmax.f32 %v1129_v45, %v1135_v55  ;;  %v1500_v45 = vld [vmem:[#allocation6 + $0xf0] sm:$0xff] }
 0x2d6   :  { %v2503_v48 = vpack.c.bf16 %v1501_v46, %v1500_v45  ;;  %v1504_v55 = vld [vmem:[#allocation6 + $0x110] sm:$0x1] }
 0x2d7   :  { %v1156_v61 = vrot.slane %v3010_v56, 7  ;;  %v1593_v3 = vrot.slane %v3010_v56, 4  ;;  %v1680_v5 = vrot.slane %v3010_v56, 5  ;;  %v1332_v30 = vrot.slane %v3010_v56, 1 }
 0x2d8   :  { %v1133_v59 = vpop.permute.xlu0 %1132  ;;  %v1419_v43 = vrot.slane %v3010_v56, 2  ;;  %v1506_v57 = vrot.slane %v3010_v56, 3 }
 0x2d9   :  { %v3012_v60 = vmax.f32 %v1128_v41, %v1133_v59  ;;  %v1587_v59 = vld [vmem:[#allocation6 + $0x128] sm:$0xff] }
 0x2db   :  { %v1158_v1 = vsel %vm1157_vm8, %v1156_v61, %v3012_v60  ;;  %v1592_v2 = vrot.slane %v3012_v60, 5  ;;  %v1679_v4 = vrot.slane %v3012_v60, 6  ;;  %v1245_v15 = vrot.slane %v3012_v60, 1  ;;  %v1588_v61 = vld [vmem:[#allocation6 + $0x130] sm:$0xff] }
 0x2dc   :  { %2220 = vmatmul.mubr.msk.f32.vlgmr.msra.gmra.mrb[28].mxu0 %vm1159_vm9, %v1158_v1  ;;  %v1331_v28 = vrot.slane %v3012_v60, 2  ;;  %v1418_v41 = vrot.slane %v3012_v60, 3  ;;  %v1505_v54 = vrot.slane %v3012_v60, 4  ;;  %v2512_v63 = vpack.c.bf16 %v1588_v61, %v1587_v59  ;;  %v1589_v60 = vld [vmem:[#allocation6 + $0x138] sm:$0xff]  ;;  %v1672_v1 = vld [vmem:[#allocation6 + $0x150] sm:$0xff] }
 0x2dd   :  { %2474 = vmatpush3.bf16.msra.mxu0 %v2473_v62  ;;  %2236 = vmatprep.mubr.msk.f32.mxu0 %vm2682_vm5, %v2680_v7  ;;  %v3026_v10 = vsel %vm1157_vm8, %v1593_v3, %v1592_v2  ;;  %v3029_v11 = vsel %vm1157_vm8, %v1680_v5, %v1679_v4  ;;  %v1246_v21 = vsel %vm1157_vm8, %v3010_v56, %v1245_v15  ;;  %v1590_v56 = vld [vmem:[#allocation6 + $0x140] sm:$0xff]  ;;  %v1673_v2 = vld [vmem:[#allocation6 + $0x158] sm:$0xff]  ;;  %v1591_v3 = vld [vmem:[#allocation6 + $0x148] sm:$0x1] }
 0x2de   :  { %2475 = vmatprep.subr.bf16.mxu0 %v2681_v18  ;;  %v1333_v34 = vsel %vm1157_vm8, %v1332_v30, %v1331_v28  ;;  %v1420_v47 = vsel %vm1157_vm8, %v1419_v43, %v1418_v41  ;;  %v1507_v62 = vsel %vm1157_vm8, %v1506_v57, %v1505_v54  ;;  %v2515_v0 = vpack.c.bf16 %v1590_v56, %v1589_v60  ;;  %v1674_v5 = vld [vmem:[#allocation6 + $0x160] sm:$0xff]  ;;  %v1769_v15 = vld [vmem:[%s3120_s6 + $0x38] sm:$0xff] }
 0x2df   :  { %v2518_v4 = vpack.c.bf16 %v1673_v2, %v1672_v1 }
 0x2e1   :  { %2477 = vmatpush3.bf16.msra.mxu0 %v2476_v6  ;;  %v1675_v6 = vld [vmem:[#allocation6 + $0x168] sm:$0xff] }
 0x2e2   :  { %2478 = vmatprep.subr.bf16.mxu0 %v2681_v18  ;;  %v2521_v8 = vpack.c.bf16 %v1675_v6, %v1674_v5 }
 0x2e5   :  { %2480 = vmatpush3.bf16.msra.mxu0 %v2479_v12  ;;  %v1677_v12 = vld [vmem:[#allocation6 + $0x178] sm:$0xff] }
 0x2e6   :  { %2234 = vmatprep.subr.mxu0 %v2680_v7  ;;  %v2524_v13 = vpack.c.bf16 %v1677_v12, %v1676_v9 }
 0x2e9   :  { %2235 = vmatpush3.msk.msra.mxu0 %vm1162_vm4, %v1244_v16 }
 0x2ea   :  { %2237 = vmatmul.mubr.msk.f32.vlgmr.msra.gmra.mrb[28].mxu0 %vm1159_vm9, %v1246_v21  ;;  %2481 = vmatprep.subr.bf16.mxu0 %v2681_v18 }
 0x2eb   :  { %2483 = vmatpush3.bf16.msra.mxu0 %v2482_v17  ;;  %2253 = vmatprep.mubr.msk.f32.mxu0 %vm2682_vm5, %v2680_v7  ;;  %v1759_v17 = vstv %s1869_s25 }
 0x2ec   :  { %2484 = vmatprep.subr.bf16.mxu0 %v2681_v18 }
 0x2ef   :  { %2486 = vmatpush3.bf16.msra.mxu0 %v2485_v22  ;;  %v1934_v22 = vld [vmem:[%s3121_s7] ss:$0 sm:$0xff] }
 0x2f0   :  { %2487 = vmatprep.subr.bf16.mxu0 %v2681_v18 }
 0x2f3   :  { %2489 = vmatpush3.bf16.msra.mxu0 %v2488_v25 }
 0x2f4   :  { %2251 = vmatprep.subr.mxu0 %v2680_v7 }
 0x2f7   :  { %2252 = vmatpush3.msk.msra.mxu0 %vm1162_vm4, %v1330_v29 }
 0x2f8   :  { %2254 = vmatmul.mubr.msk.f32.vlgmr.msra.gmra.mrb[28].mxu0 %vm1159_vm9, %v1333_v34  ;;  %2490 = vmatprep.subr.bf16.mxu0 %v2681_v18 }
 0x2f9   :  { %2492 = vmatpush3.bf16.msra.mxu0 %v2491_v31  ;;  %2270 = vmatprep.mubr.msk.f32.mxu0 %vm2682_vm5, %v2680_v7 }
 0x2fa   :  { %2493 = vmatprep.subr.bf16.mxu0 %v2681_v18 }
 0x2fd   :  { %2495 = vmatpush3.bf16.msra.mxu0 %v2494_v35 }
 0x2fe   :  { %2496 = vmatprep.subr.bf16.mxu0 %v2681_v18 }
 0x301   :  { %2498 = vmatpush3.bf16.msra.mxu0 %v2497_v38 }
 0x302   :  { %2268 = vmatprep.subr.mxu0 %v2680_v7 }
 0x305   :  { %2269 = vmatpush3.msk.msra.mxu0 %vm1162_vm4, %v1417_v42 }
 0x306   :  { %2271 = vmatmul.mubr.msk.f32.vlgmr.msra.gmra.mrb[28].mxu0 %vm1159_vm9, %v1420_v47  ;;  %2499 = vmatprep.subr.bf16.mxu0 %v2681_v18 }
 0x307   :  { %2501 = vmatpush3.bf16.msra.mxu0 %v2500_v44  ;;  %2287 = vmatprep.mubr.msk.f32.mxu0 %vm2682_vm5, %v2680_v7 }
 0x308   :  { %2502 = vmatprep.subr.bf16.mxu0 %v2681_v18 }
 0x30b   :  { %2504 = vmatpush3.bf16.msra.mxu0 %v2503_v48 }
 0x30c   :  { %2505 = vmatprep.subr.bf16.mxu0 %v2681_v18 }
 0x30f   :  { %2507 = vmatpush3.bf16.msra.mxu0 %v2506_v51 }
 0x310   :  { %2285 = vmatprep.subr.mxu0 %v2680_v7 }
 0x313   :  { %2286 = vmatpush3.msk.msra.mxu0 %vm1162_vm4, %v1504_v55 }
 0x314   :  { %2288 = vmatmul.mubr.msk.f32.vlgmr.msra.gmra.mrb[28].mxu0 %vm1159_vm9, %v1507_v62  ;;  %2508 = vmatprep.subr.bf16.mxu0 %v2681_v18 }
 0x315   :  { %2510 = vmatpush3.bf16.msra.mxu0 %v2509_v58  ;;  %2304 = vmatprep.mubr.msk.f32.mxu0 %vm2682_vm5, %v2680_v7 }
 0x316   :  { %2511 = vmatprep.subr.bf16.mxu0 %v2681_v18 }
 0x319   :  { %2513 = vmatpush3.bf16.msra.mxu0 %v2512_v63 }
 0x31a   :  { %2514 = vmatprep.subr.bf16.mxu0 %v2681_v18 }
 0x31d   :  { %2516 = vmatpush3.bf16.msra.mxu0 %v2515_v0 }
 0x31e   :  { %2302 = vmatprep.subr.mxu0 %v2680_v7 }
 0x321   :  { %2303 = vmatpush3.msk.msra.mxu0 %vm1162_vm4, %v1591_v3 }
 0x322   :  { %2305 = vmatmul.mubr.msk.f32.vlgmr.msra.gmra.mrb[28].mxu0 %vm1159_vm9, %v3026_v10  ;;  %2517 = vmatprep.subr.bf16.mxu0 %v2681_v18  ;;  %v1768_v10 = vld [vmem:[%s3120_s6 + $0x30] sm:$0xff]  ;;  %s2684_s6 = smov [#allocation9]  }
 0x323   :  { %2519 = vmatpush3.bf16.msra.mxu0 %v2518_v4  ;;  %2321 = vmatprep.mubr.msk.f32.mxu0 %vm2682_vm5, %v2680_v7  ;;  %v2536_v16 = vpack.c.bf16 %v1769_v15, %v1768_v10  ;;  %s1858_s29 = sshll.u32 %s2684_s6, 4  ;;  %s1859_s29 = int_to_ptr.vmem [resolvable:$true] %s1858_s29 }
 0x324   :  { %2520 = vmatprep.subr.bf16.mxu0 %v2681_v18  ;;  %p2650_p8 = scmp.lt.s32.totalorder %s1859_s29, %s1859_s29 }
 0x325   :  { %2537 = vmatpush3.bf16.msra.mxu1 %v2536_v16 }
 0x327   :  { %2522 = vmatpush3.bf16.msra.mxu0 %v2521_v8 }
 0x328   :  { %2523 = vmatprep.subr.bf16.mxu0 %v2681_v18 }
 0x32b   :  { %2525 = vmatpush3.bf16.msra.mxu0 %v2524_v13 }
 0x32c   :  { %2319 = vmatprep.subr.mxu0 %v2680_v7  ;;  %v1919_v7 = vld [vmem:[%s3119_s5] ss:$0 sm:$0xff]  ;;  %s2645_s5 = scalar_lea.vmem %s1859_s29, 32 }
 0x32d   :  { %p2646_p7 = scmp.ne.s32.totalorder %s1859_s29, %s2645_s5  ;;  %p2651_p9 = scmp.lt.s32.totalorder %s2645_s5, %s2645_s5 }
 0x32f   :  { %2320 = vmatpush3.msk.msra.mxu0 %vm1162_vm4, %v1678_v14  ;;  %p2652_p10 = por %p2651_p9, %p2650_p8 }
 0x330   :  { %2322 = vmatmul.mubr.msk.f32.vlgmr.msra.gmra.mrb[28].mxu0 %vm1159_vm9, %v3029_v11 }
 0x331   :  { %p2653_p11 = pnand %p2652_p10, %p2646_p7 }
 0x403   :  { %v1753_v18 = vpop.f32.mrb[28].mxu0 }
 0x404   :  { %v2546_v19 = vadd.f32 %v1919_v7, %v1753_v18  ;;  %v2323_v20 = vpop.f32.mrb[29].mxu0 }
 0x406   :  { %vm1758_vm10 = vcmp.gt.f32.partialorder %v2546_v19, 0.0  ;;  %v1760_v11 = vmul.f32 %v2546_v19, %v1759_v17 }
 0x408   :  { %v1761_v21 = vsel %vm1758_vm10, %v2546_v19, %v1760_v11 }
 0x409   :  { %2341 = vmatmul.mubr.msk.f32.vlgmr.msra.gmra.mrb[24].mxu1 %vm483_vm1, %v1761_v21 }
 0x4dc   :  { %v1846_v23 = vpop.f32.mrb[24].mxu1 }
 0x4dd   :  { %v1847_v24 = vadd.f32 %v1934_v22, %v1846_v23  ;;  %v2342_v25 = vpop.f32.mrb[25].mxu1 }
 0x4df   :  { %1851 = vst.msk [vmem:[#allocation9] sm:$0x3] %vm1850_vm11, %v1847_v24 }
 0x4e0   :  { %2656 = shalt.err (!%p2653_p11)
}
 0x4e1   :  { %s2657_s11 = scalar_lea.hbm %s3123_s9, 32 }
 0x4e2   :  { %p2658_p12 = scmp.ne.s32.totalorder %s3123_s9, %s2657_s11  ;;  %p2661_p13 = scmp.lt.u32.totalorder %s2657_s11, %s3123_s9 }
 0x4e4   :  { %p2663_p0 = pnand %p2661_p13, %p2658_p12 }
 0x4e6   :  { %2666 = shalt.err (!%p2663_p0)
}
 0x4e7   :  { %1861 = dma.vmem_to_hbm [thread:$0]  %s1859_s29, 32, %s3123_s9, [#allocation4]  }
 0x4e8   :  { %2673 = dma.done.wait [#allocation4], 32  }
 0x4e9   :  { %2674 = vsyncadd [#allocation4], 4294967264 }
 0x4ea   :  { %1865 = vsyncpa [#allocation3], 1 }
 0x4eb   :  { %1866 = vsyncpa [#allocation7], 1 }
 0x4ec   :  { %1867 = vsyncpa [#allocation4], 1 }
 0x4ed   :  { %1868 = vsyncpa [#allocation5], 1 }

</bundles_post_ra>
